<compile_context>
chip_gen: v5e
topology: v5e:2x2
jax: 0.10.0
libtpu: 0.0.40
codegen_flags: <defaults>
</compile_context>

<pallas_src>
import functools

import jax
import jax.numpy as jnp
import numpy as np
from jax.experimental import pallas as pl
from jax.experimental.pallas import tpu as pltpu


# ----------------------------------------------------------------------------
# Kernels
# ----------------------------------------------------------------------------
def _stats_mlp_kernel(x_ref, w1_ref, b1_ref, w2_ref, b2_ref, y_ref,
                      sum_acc, sq_acc, *, hw_total, hw_tile, need_mask):
    # Per-(batch, channel) spatial sum / sum-of-squares accumulation, then on
    # the final spatial tile: mean + std  ->  1x1 conv -> ReLU -> 1x1 conv ->
    # sigmoid  (the CCALayer "conv_du" squeeze-excite MLP).
    t = pl.program_id(1)
    nt = pl.num_programs(1)

    @pl.when(t == 0)
    def _():
        sum_acc[...] = jnp.zeros_like(sum_acc)
        sq_acc[...] = jnp.zeros_like(sq_acc)

    x = x_ref[0].astype(jnp.float32)                      # (C, THW)
    if need_mask:
        lane = jax.lax.broadcasted_iota(jnp.int32, x.shape, 1)
        valid = (t * hw_tile + lane) < hw_total
        x = jnp.where(valid, x, 0.0)
    sum_acc[...] += jnp.sum(x, axis=-1, keepdims=True)     # (C, 1)
    sq_acc[...] += jnp.sum(x * x, axis=-1, keepdims=True)  # (C, 1)

    @pl.when(t == nt - 1)
    def _():
        inv_n = jnp.float32(1.0 / hw_total)
        mean = sum_acc[...] * inv_n                        # (C, 1)
        var = jnp.maximum(sq_acc[...] * inv_n - mean * mean, 0.0)
        stat = jnp.sqrt(var) + mean                        # stdv + avg_pool

        # Broadcast the column vector across 128 lanes so both matmuls are
        # MXU-friendly (avoids an N=1 dot); only lane 0 is kept at the end.
        stat_b = jnp.broadcast_to(stat, (stat.shape[0], 128))       # (C, 128)
        h = jnp.dot(w1_ref[...], stat_b,
                    preferred_element_type=jnp.float32) + b1_ref[...]
        h = jnp.maximum(h, 0.0)                                     # ReLU
        z = jnp.dot(w2_ref[...], h,
                    preferred_element_type=jnp.float32) + b2_ref[...]
        gate = 1.0 / (1.0 + jnp.exp(-z))                            # sigmoid
        y_ref[0] = gate[:, 0:1].astype(y_ref.dtype)                 # (C, 1)


def _scale_kernel(x_ref, y_ref, o_ref):
    # out = x * y   (y broadcast over the spatial/lane axis)
    o_ref[0] = (x_ref[0].astype(jnp.float32) *
                y_ref[0].astype(jnp.float32)).astype(o_ref.dtype)


# ----------------------------------------------------------------------------
# Wrapper
# ----------------------------------------------------------------------------
def _choose_hw_tile(hw, c, itemsize):
    # ~12 MiB live-buffer budget (double-buffered in + out blocks of (C, THW))
    # -> safe on v7x's 64 MiB physical VMEM and leaves headroom on v5e/v6e.
    budget = 12 * 1024 * 1024
    cap = budget // (4 * c * itemsize)
    cap = max(128, (cap // 128) * 128)   # lane-dense multiples of 128
    return hw if hw <= cap else cap


def cca_forward(x_nchw, params):
    B, C, H, W = x_nchw.shape
    HW = H * W
    w1, b1, w2, b2 = params["w1"], params["b1"], params["w2"], params["b2"]
    Cr = w1.shape[0]

    x3 = x_nchw.reshape(B, C, HW)                 # metadata-only reshape
    thw = _choose_hw_tile(HW, C, x3.dtype.itemsize)
    n_hw = pl.cdiv(HW, thw)
    need_mask = (HW % thw) != 0

    b1c = b1.reshape(Cr, 1)
    b2c = b2.reshape(C, 1)

    stats_kernel = functools.partial(
        _stats_mlp_kernel, hw_total=HW, hw_tile=thw, need_mask=need_mask)

    # Pass 1: per-channel contrast + mean, fused squeeze-excite gate.
    y = pl.pallas_call(
        stats_kernel,
        out_shape=jax.ShapeDtypeStruct((B, C, 1), jnp.float32),
        grid=(B, n_hw),
        in_specs=[pl.BlockSpec((1, C, thw), lambda b, t: (b, 0, t)),
                  pl.BlockSpec((Cr, C), lambda b, t: (0, 0)),
                  pl.BlockSpec((Cr, 1), lambda b, t: (0, 0)),
                  pl.BlockSpec((C, Cr), lambda b, t: (0, 0)),
                  pl.BlockSpec((C, 1), lambda b, t: (0, 0))],
        out_specs=pl.BlockSpec((1, C, 1), lambda b, t: (b, 0, 0)),
        scratch_shapes=[pltpu.VMEM((C, 1), jnp.float32),
                        pltpu.VMEM((C, 1), jnp.float32)],
        compiler_params=pltpu.CompilerParams(
            dimension_semantics=("parallel", "arbitrary")),
    )(x3, w1, b1c, w2, b2c)

    # Pass 2: x * y (broadcast), lane-dense tiles.
    out3 = pl.pallas_call(
        _scale_kernel,
        out_shape=jax.ShapeDtypeStruct((B, C, HW), x3.dtype),
        grid=(B, n_hw),
        in_specs=[pl.BlockSpec((1, C, thw), lambda b, t: (b, 0, t)),
                  pl.BlockSpec((1, C, 1), lambda b, t: (b, 0, 0))],
        out_specs=pl.BlockSpec((1, C, thw), lambda b, t: (b, 0, t)),
        compiler_params=pltpu.CompilerParams(
            dimension_semantics=("parallel", "parallel")),
    )(x3, y)

    return out3.reshape(B, C, H, W)


# ----------------------------------------------------------------------------
# Pure-JAX reference (mirrors the PyTorch CCALayer) for sanity checking
# ----------------------------------------------------------------------------
def reference_forward(x, params):
    w1, b1, w2, b2 = params["w1"], params["b1"], params["w2"], params["b2"]
    mean = jnp.mean(x, axis=(2, 3), keepdims=True)
    var = jnp.mean((x - mean) ** 2, axis=(2, 3), keepdims=True)
    y = jnp.sqrt(var) + mean                                    # contrast + avg
    h = jnp.einsum("bcxy,oc->boxy", y, w1) + b1[None, :, None, None]
    h = jnp.maximum(h, 0.0)
    z = jnp.einsum("bcxy,oc->boxy", h, w2) + b2[None, :, None, None]
    z = jax.nn.sigmoid(z)
    return x * z


def init_params(key, channel, reduction=16):
    cr = channel // reduction
    k1, k2, k3, k4 = jax.random.split(key, 4)
    return {
        "w1": 0.1 * jax.random.normal(k1, (cr, channel), jnp.float32),
        "b1": 0.05 * jax.random.normal(k2, (cr,), jnp.float32),
        "w2": 0.1 * jax.random.normal(k3, (channel, cr), jnp.float32),
        "b2": 0.05 * jax.random.normal(k4, (channel,), jnp.float32),
    }


if __name__ == "__main__":
    B, C, H, W = 2, 64, 16, 16
    reduction = 16

    key = jax.random.PRNGKey(0)
    kx, kp = jax.random.split(key)
    x = jax.random.normal(kx, (B, C, H, W), jnp.float32)
    params = init_params(kp, C, reduction)

    fwd = jax.jit(cca_forward)
    out = jax.block_until_ready(fwd(x, params))
    ref = jax.block_until_ready(reference_forward(x, params))

    assert out.shape == (B, C, H, W)
    np.testing.assert_allclose(np.asarray(out), np.asarray(ref),
                               atol=1e-4, rtol=1e-4)
    print("KERNEL_OK")
</pallas_src>

<mosaic_0001>
module attributes {stable_mosaic.version = 11 : i64} {
  func.func @_stats_mlp_kernel(%arg0: i32, %arg1: i32, %arg2: memref<1x64x256xf32, #tpu.memory_space<vmem>>, %arg3: memref<4x64xf32, #tpu.memory_space<vmem>>, %arg4: memref<4x1xf32, #tpu.memory_space<vmem>>, %arg5: memref<64x4xf32, #tpu.memory_space<vmem>>, %arg6: memref<64x1xf32, #tpu.memory_space<vmem>>, %arg7: memref<1x64x1xf32, #tpu.memory_space<vmem>>, %arg8: memref<64x1xf32, #tpu.memory_space<vmem>>, %arg9: memref<64x1xf32, #tpu.memory_space<vmem>>) attributes {dimension_semantics = [#tpu.dimension_semantics<parallel>, #tpu.dimension_semantics<arbitrary>], iteration_bounds = array<i64: 2, 1>, scalar_prefetch = 0 : i64, scratch_operands = 2 : i64, tpu.core_type = #tpu.core_type<tc>, window_params = [{transform_indices = @transform_0, window_bounds = array<i64: 1, 64, 256>}, {pipeline_mode = #tpu.pipeline_mode<synchronous>, transform_indices = @transform_1, window_bounds = array<i64: 4, 64>}, {pipeline_mode = #tpu.pipeline_mode<synchronous>, transform_indices = @transform_2, window_bounds = array<i64: 4, 1>}, {pipeline_mode = #tpu.pipeline_mode<synchronous>, transform_indices = @transform_3, window_bounds = array<i64: 64, 4>}, {pipeline_mode = #tpu.pipeline_mode<synchronous>, transform_indices = @transform_4, window_bounds = array<i64: 64, 1>}, {transform_indices = @transform_5, window_bounds = array<i64: 1, 64, 1>}]} {
    %c0_i32 = arith.constant 0 : i32
    %0 = arith.cmpi eq, %arg1, %c0_i32 : i32
    %1 = arith.extui %0 : i1 to i32
    %c0_i32_0 = arith.constant 0 : i32
    %2 = arith.cmpi ne, %1, %c0_i32_0 : i32
    scf.if %2 {
      %cst_14 = arith.constant 0.000000e+00 : f32
      %19 = vector.broadcast %cst_14 : f32 to vector<64x1xf32>
      %c0_15 = arith.constant 0 : index
      %c0_16 = arith.constant 0 : index
      %20 = vector.load %arg8[%c0_15, %c0_16] : memref<64x1xf32, #tpu.memory_space<vmem>>, vector<64x1xf32>
      tpu.vector_store %arg8[%c0_15, %c0_16], %19 {strides = array<i32>} : memref<64x1xf32, #tpu.memory_space<vmem>>, vector<64x1xf32>,
      %cst_17 = arith.constant 0.000000e+00 : f32
      %21 = vector.broadcast %cst_17 : f32 to vector<64x1xf32>
      %c0_18 = arith.constant 0 : index
      %c0_19 = arith.constant 0 : index
      %22 = vector.load %arg9[%c0_18, %c0_19] : memref<64x1xf32, #tpu.memory_space<vmem>>, vector<64x1xf32>
      tpu.vector_store %arg9[%c0_18, %c0_19], %21 {strides = array<i32>} : memref<64x1xf32, #tpu.memory_space<vmem>>, vector<64x1xf32>,
    } else {
    }
    %c0 = arith.constant 0 : index
    %c0_1 = arith.constant 0 : index
    %c0_2 = arith.constant 0 : index
    %3 = vector.load %arg2[%c0, %c0_1, %c0_2] : memref<1x64x256xf32, #tpu.memory_space<vmem>>, vector<1x64x256xf32>
    %4 = vector.shape_cast %3 : vector<1x64x256xf32> to vector<64x256xf32>
    %c0_3 = arith.constant 0 : index
    %c0_4 = arith.constant 0 : index
    %5 = vector.load %arg8[%c0_3, %c0_4] : memref<64x1xf32, #tpu.memory_space<vmem>>, vector<64x1xf32>
    %cst = arith.constant dense<0.000000e+00> : vector<64xf32>
    %6 = vector.multi_reduction <add>, %4, %cst [1] : vector<64x256xf32> to vector<64xf32>
    %7 = vector.shape_cast %6 : vector<64xf32> to vector<64x1xf32>
    %8 = arith.addf %5, %7 : vector<64x1xf32>
    %c0_5 = arith.constant 0 : index
    %c0_6 = arith.constant 0 : index
    %9 = vector.load %arg8[%c0_5, %c0_6] : memref<64x1xf32, #tpu.memory_space<vmem>>, vector<64x1xf32>
    tpu.vector_store %arg8[%c0_5, %c0_6], %8 {strides = array<i32>} : memref<64x1xf32, #tpu.memory_space<vmem>>, vector<64x1xf32>,
    %c0_7 = arith.constant 0 : index
    %c0_8 = arith.constant 0 : index
    %10 = vector.load %arg9[%c0_7, %c0_8] : memref<64x1xf32, #tpu.memory_space<vmem>>, vector<64x1xf32>
    %11 = arith.mulf %4, %4 : vector<64x256xf32>
    %cst_9 = arith.constant dense<0.000000e+00> : vector<64xf32>
    %12 = vector.multi_reduction <add>, %11, %cst_9 [1] : vector<64x256xf32> to vector<64xf32>
    %13 = vector.shape_cast %12 : vector<64xf32> to vector<64x1xf32>
    %14 = arith.addf %10, %13 : vector<64x1xf32>
    %c0_10 = arith.constant 0 : index
    %c0_11 = arith.constant 0 : index
    %15 = vector.load %arg9[%c0_10, %c0_11] : memref<64x1xf32, #tpu.memory_space<vmem>>, vector<64x1xf32>
    tpu.vector_store %arg9[%c0_10, %c0_11], %14 {strides = array<i32>} : memref<64x1xf32, #tpu.memory_space<vmem>>, vector<64x1xf32>,
    %c0_i32_12 = arith.constant 0 : i32
    %16 = arith.cmpi eq, %arg1, %c0_i32_12 : i32
    %17 = arith.extui %16 : i1 to i32
    %c0_i32_13 = arith.constant 0 : i32
    %18 = arith.cmpi ne, %17, %c0_i32_13 : i32
    scf.if %18 {
      %c0_14 = arith.constant 0 : index
      %c0_15 = arith.constant 0 : index
      %19 = vector.load %arg8[%c0_14, %c0_15] : memref<64x1xf32, #tpu.memory_space<vmem>>, vector<64x1xf32>
      %cst_16 = arith.constant 3.906250e-03 : f32
      %20 = vector.broadcast %cst_16 : f32 to vector<64x1xf32>
      %21 = arith.mulf %19, %20 : vector<64x1xf32>
      %c0_17 = arith.constant 0 : index
      %c0_18 = arith.constant 0 : index
      %22 = vector.load %arg9[%c0_17, %c0_18] : memref<64x1xf32, #tpu.memory_space<vmem>>, vector<64x1xf32>
      %cst_19 = arith.constant 3.906250e-03 : f32
      %23 = vector.broadcast %cst_19 : f32 to vector<64x1xf32>
      %24 = arith.mulf %22, %23 : vector<64x1xf32>
      %25 = arith.mulf %21, %21 : vector<64x1xf32>
      %26 = arith.subf %24, %25 : vector<64x1xf32>
      %cst_20 = arith.constant 0.000000e+00 : f32
      %27 = vector.broadcast %cst_20 : f32 to vector<64x1xf32>
      %28 = arith.maximumf %26, %27 : vector<64x1xf32>
      %29 = math.sqrt %28 : vector<64x1xf32>
      %30 = arith.addf %29, %21 : vector<64x1xf32>
      %31 = vector.shape_cast %30 : vector<64x1xf32> to vector<64x1xf32>
      %32 = vector.broadcast %31 : vector<64x1xf32> to vector<64x128xf32>
      %c0_21 = arith.constant 0 : index
      %c0_22 = arith.constant 0 : index
      %33 = vector.load %arg3[%c0_21, %c0_22] : memref<4x64xf32, #tpu.memory_space<vmem>>, vector<4x64xf32>
      %cst_23 = arith.constant dense<0.000000e+00> : vector<4x128xf32>
      %34 = tpu.matmul %33, %32, %cst_23 {dimension_numbers = #tpu.dot_dimension_numbers<[1], [0], [0], [1], [0, 0, 1, 1], [], []>} : vector<4x64xf32>, vector<64x128xf32>, vector<4x128xf32> -> vector<4x128xf32>
      %c0_24 = arith.constant 0 : index
      %c0_25 = arith.constant 0 : index
      %35 = vector.load %arg4[%c0_24, %c0_25] : memref<4x1xf32, #tpu.memory_space<vmem>>, vector<4x1xf32>
      %36 = vector.broadcast %35 : vector<4x1xf32> to vector<4x128xf32>
      %37 = arith.addf %34, %36 : vector<4x128xf32>
      %cst_26 = arith.constant 0.000000e+00 : f32
      %38 = vector.broadcast %cst_26 : f32 to vector<4x128xf32>
      %39 = arith.maximumf %37, %38 : vector<4x128xf32>
      %c0_27 = arith.constant 0 : index
      %c0_28 = arith.constant 0 : index
      %40 = vector.load %arg5[%c0_27, %c0_28] : memref<64x4xf32, #tpu.memory_space<vmem>>, vector<64x4xf32>
      %cst_29 = arith.constant dense<0.000000e+00> : vector<64x128xf32>
      %41 = tpu.matmul %40, %39, %cst_29 {dimension_numbers = #tpu.dot_dimension_numbers<[1], [0], [0], [1], [0, 0, 1, 1], [], []>} : vector<64x4xf32>, vector<4x128xf32>, vector<64x128xf32> -> vector<64x128xf32>
      %c0_30 = arith.constant 0 : index
      %c0_31 = arith.constant 0 : index
      %42 = vector.load %arg6[%c0_30, %c0_31] : memref<64x1xf32, #tpu.memory_space<vmem>>, vector<64x1xf32>
      %43 = vector.broadcast %42 : vector<64x1xf32> to vector<64x128xf32>
      %44 = arith.addf %41, %43 : vector<64x128xf32>
      %cst_32 = arith.constant 0.000000e+00 : f32
      %45 = vector.broadcast %cst_32 : f32 to vector<64x128xf32>
      %46 = arith.subf %45, %44 : vector<64x128xf32>
      %47 = math.exp %46 : vector<64x128xf32>
      %cst_33 = arith.constant 1.000000e+00 : f32
      %48 = vector.broadcast %cst_33 : f32 to vector<64x128xf32>
      %49 = arith.addf %48, %47 : vector<64x128xf32>
      %cst_34 = arith.constant 1.000000e+00 : f32
      %50 = vector.broadcast %cst_34 : f32 to vector<64x128xf32>
      %51 = arith.divf %50, %49 : vector<64x128xf32>
      %52 = vector.extract_strided_slice %51 {offsets = [0, 0], sizes = [64, 1], strides = [1, 1]} : vector<64x128xf32> to vector<64x1xf32>
      %c0_35 = arith.constant 0 : index
      %c0_36 = arith.constant 0 : index
      %c0_37 = arith.constant 0 : index
      %53 = vector.load %arg7[%c0_35, %c0_36, %c0_37] : memref<1x64x1xf32, #tpu.memory_space<vmem>>, vector<1x64x1xf32>
      %54 = vector.shape_cast %53 : vector<1x64x1xf32> to vector<64x1xf32>
      %55 = vector.shape_cast %52 : vector<64x1xf32> to vector<1x64x1xf32>
      tpu.vector_store %arg7[%c0_35, %c0_36, %c0_37], %55 {strides = array<i32>} : memref<1x64x1xf32, #tpu.memory_space<vmem>>, vector<1x64x1xf32>,
    } else {
    }
    return
  }
  func.func @transform_0(%arg0: i32, %arg1: i32) -> (i32, i32, i32) {
    %c0_i32 = arith.constant 0 : i32
    %c0_i32_0 = arith.constant 0 : i32
    return %arg0, %c0_i32, %arg1 : i32, i32, i32
  }
  func.func @transform_1(%arg0: i32, %arg1: i32) -> (i32, i32) {
    %c0_i32 = arith.constant 0 : i32
    %c0_i32_0 = arith.constant 0 : i32
    %c0_i32_1 = arith.constant 0 : i32
    return %c0_i32, %c0_i32_0 : i32, i32
  }
  func.func @transform_2(%arg0: i32, %arg1: i32) -> (i32, i32) {
    %c0_i32 = arith.constant 0 : i32
    %c0_i32_0 = arith.constant 0 : i32
    %c0_i32_1 = arith.constant 0 : i32
    return %c0_i32, %c0_i32_0 : i32, i32
  }
  func.func @transform_3(%arg0: i32, %arg1: i32) -> (i32, i32) {
    %c0_i32 = arith.constant 0 : i32
    %c0_i32_0 = arith.constant 0 : i32
    %c0_i32_1 = arith.constant 0 : i32
    return %c0_i32, %c0_i32_0 : i32, i32
  }
  func.func @transform_4(%arg0: i32, %arg1: i32) -> (i32, i32) {
    %c0_i32 = arith.constant 0 : i32
    %c0_i32_0 = arith.constant 0 : i32
    %c0_i32_1 = arith.constant 0 : i32
    return %c0_i32, %c0_i32_0 : i32, i32
  }
  func.func @transform_5(%arg0: i32, %arg1: i32) -> (i32, i32, i32) {
    %c0_i32 = arith.constant 0 : i32
    %c0_i32_0 = arith.constant 0 : i32
    %c0_i32_1 = arith.constant 0 : i32
    return %arg0, %c0_i32, %c0_i32_0 : i32, i32, i32
  }
}

module attributes {stable_mosaic.version = 11 : i64} {
  func.func @_scale_kernel(%arg0: i32, %arg1: i32, %arg2: memref<1x64x256xf32, #tpu.memory_space<vmem>>, %arg3: memref<1x64x1xf32, #tpu.memory_space<vmem>>, %arg4: memref<1x64x256xf32, #tpu.memory_space<vmem>>) attributes {dimension_semantics = [#tpu.dimension_semantics<parallel>, #tpu.dimension_semantics<parallel>], iteration_bounds = array<i64: 2, 1>, scalar_prefetch = 0 : i64, scratch_operands = 0 : i64, tpu.core_type = #tpu.core_type<tc>, window_params = [{transform_indices = @transform_0, window_bounds = array<i64: 1, 64, 256>}, {transform_indices = @transform_1, window_bounds = array<i64: 1, 64, 1>}, {transform_indices = @transform_2, window_bounds = array<i64: 1, 64, 256>}]} {
    %c0 = arith.constant 0 : index
    %c0_0 = arith.constant 0 : index
    %c0_1 = arith.constant 0 : index
    %0 = vector.load %arg2[%c0, %c0_0, %c0_1] : memref<1x64x256xf32, #tpu.memory_space<vmem>>, vector<1x64x256xf32>
    %1 = vector.shape_cast %0 : vector<1x64x256xf32> to vector<64x256xf32>
    %c0_2 = arith.constant 0 : index
    %c0_3 = arith.constant 0 : index
    %c0_4 = arith.constant 0 : index
    %2 = vector.load %arg3[%c0_2, %c0_3, %c0_4] : memref<1x64x1xf32, #tpu.memory_space<vmem>>, vector<1x64x1xf32>
    %3 = vector.shape_cast %2 : vector<1x64x1xf32> to vector<64x1xf32>
    %4 = vector.broadcast %3 : vector<64x1xf32> to vector<64x256xf32>
    %5 = arith.mulf %1, %4 : vector<64x256xf32>
    %c0_5 = arith.constant 0 : index
    %c0_6 = arith.constant 0 : index
    %c0_7 = arith.constant 0 : index
    %6 = vector.load %arg4[%c0_5, %c0_6, %c0_7] : memref<1x64x256xf32, #tpu.memory_space<vmem>>, vector<1x64x256xf32>
    %7 = vector.shape_cast %6 : vector<1x64x256xf32> to vector<64x256xf32>
    %8 = vector.shape_cast %5 : vector<64x256xf32> to vector<1x64x256xf32>
    tpu.vector_store %arg4[%c0_5, %c0_6, %c0_7], %8 {strides = array<i32>} : memref<1x64x256xf32, #tpu.memory_space<vmem>>, vector<1x64x256xf32>,
    return
  }
  func.func @transform_0(%arg0: i32, %arg1: i32) -> (i32, i32, i32) {
    %c0_i32 = arith.constant 0 : i32
    %c0_i32_0 = arith.constant 0 : i32
    return %arg0, %c0_i32, %arg1 : i32, i32, i32
  }
  func.func @transform_1(%arg0: i32, %arg1: i32) -> (i32, i32, i32) {
    %c0_i32 = arith.constant 0 : i32
    %c0_i32_0 = arith.constant 0 : i32
    %c0_i32_1 = arith.constant 0 : i32
    return %arg0, %c0_i32, %c0_i32_0 : i32, i32, i32
  }
  func.func @transform_2(%arg0: i32, %arg1: i32) -> (i32, i32, i32) {
    %c0_i32 = arith.constant 0 : i32
    %c0_i32_0 = arith.constant 0 : i32
    return %arg0, %c0_i32, %arg1 : i32, i32, i32
  }
}

</mosaic_0001>

<bundles_post_ra>
// kernel: cca_forward.3
= control target key start
LH: loop header
LB: loop body
LE: loop exit
PB: predicated region body
PF: predicated region fallthrough
CT: control target
= control target key end

     0   :  { %s482_s9 = smov 0   ;;  %s484_s10 = smov 0   ;;  %s554_s0 = inlined_call_operand.vmem [shape: f32[2,64,256], index: 0, kind: input, shape index: {}]   ;;  %s555_s1 = inlined_call_operand.vmem [shape: f32[2,64,1], index: 1, kind: input, shape index: {}]   ;;  %s556_s2 = inlined_call_operand.vmem [shape: f32[2,64,256], index: 2, kind: output, shape index: {}]  }
   0x1   :  { %s486_s11 = smov 0  }
   0x2 LB: > { %s24_s12 = sadd.s32 1, %s460_s10  ;;  %p402_p0 = scmp.ge.s32.totalorder %s464_s11, 1  ;;  %s464_s11 = sphi %s486_s11, %s12_s11   ;;  %s460_s10 = sphi %s484_s10, %s558_s10   ;;  %s456_s9 = sphi %s482_s9, %s557_s9  }
   0x3   : > { %p26_p1 = scmp.ge.s32.totalorder %s24_s12, 2  ;;  %p143_p2 = scmp.lt.s32.totalorder %s464_s11, 3 }
   0x5   : > { %s560_s12 = smov (%p26_p1, %s24_s12), 0  ;;  %p144_p3 = pnand %p402_p0, %p143_p2 }
   0x6   : > { %p179_p4 = scmp.lt.s32.totalorder (!%p144_p3), %s456_s9, 1 }
   0x7   : > { %147 = sbr.rel (%p144_p3) target bundleno = 153 (0x99), region = 28 }
   0xc   : > { %v466_v0 = vmov 0   ;;  %s562_s9 = smov (!%p179_p4, %s456_s9), 1 }
   0xd   : > { %440 = vset.pattern.permute.xlu1 %v466_v0  ;;  %439 = vset.pattern.permute.xlu0 %v466_v0  ;;  %s412_s13 = sshll.u32 %s562_s9, 6  ;;  %s411_s17 = sshll.u32 %s562_s9, 7 }
   0xe   : > { %441 = vset.pattern.permute.xlu2 %v466_v0  ;;  %s192_s16 = scalar_lea.vmem %s555_s1, %s412_s13  ;;  %s506_s20 = scalar_lea.vmem %s554_s0, %s411_s17 }
   0xf   : > { %v221_v1 = vld [vmem:[%s192_s16 + $0x10] sm:$0xff]  ;;  %v219_v2 = vld [vmem:[%s192_s16] sm:$0xff]  ;;  %v222_v4 = vld [vmem:[%s192_s16 + $0x18] sm:$0xff]  ;;  %s513_s23 = scalar_lea.vmem %s556_s2, %s411_s17 }
  0x10   : > { %239 = vperm.xlu1 %440, %v221_v1   ;;  %229 = vperm.xlu0 %439, %v219_v2   ;;  %v223_v3 = vld [vmem:[%s192_s16 + $0x20] sm:$0xff]  ;;  %v220_v5 = vld [vmem:[%s192_s16 + $0x8] sm:$0xff]  ;;  %v226_v7 = vld [vmem:[%s192_s16 + $0x38] sm:$0xff] }
  0x11   : > { %249 = vperm.xlu2 %441, %v223_v3   ;;  %v224_v6 = vld [vmem:[%s192_s16 + $0x28] sm:$0xff]  ;;  %v225_v8 = vld [vmem:[%s192_s16 + $0x30] sm:$0xff]  ;;  %v211_v9 = vld [vmem:[%s506_s20 + $0x40] sm:$0xff] }
  0x12   : > { %v212_v10 = vld [vmem:[%s506_s20 + $0x48] sm:$0xff]  ;;  %v213_v14 = vld [vmem:[%s506_s20 + $0x50] sm:$0xff]  ;;  %v214_v15 = vld [vmem:[%s506_s20 + $0x58] sm:$0xff] }
  0x13   : > { %v207_v19 = vld [vmem:[%s506_s20 + $0x20] sm:$0xff]  ;;  %v208_v20 = vld [vmem:[%s506_s20 + $0x28] sm:$0xff]  ;;  %v209_v29 = vld [vmem:[%s506_s20 + $0x30] sm:$0xff] }
  0x14   : > { %v203_v21 = vld [vmem:[%s506_s20] sm:$0xff]  ;;  %v204_v22 = vld [vmem:[%s506_s20 + $0x8] sm:$0xff]  ;;  %v210_v30 = vld [vmem:[%s506_s20 + $0x38] sm:$0xff] }
  0x15   : > { %v205_v31 = vld [vmem:[%s506_s20 + $0x10] sm:$0xff]  ;;  %v206_v32 = vld [vmem:[%s506_s20 + $0x18] sm:$0xff]  ;;  %v215_v41 = vld [vmem:[%s506_s20 + $0x60] sm:$0xff] }
  0x16   : > { %v217_v39 = vld [vmem:[%s506_s20 + $0x70] sm:$0xff]  ;;  %v218_v40 = vld [vmem:[%s506_s20 + $0x78] sm:$0xff]  ;;  %v216_v42 = vld [vmem:[%s506_s20 + $0x68] sm:$0xff] }
  0x18   : > { %244 = vperm.xlu1 %440, %v222_v4   ;;  %234 = vperm.xlu0 %439, %v220_v5  }
  0x19   : > { %254 = vperm.xlu2 %441, %v224_v6  }
  0x20   : > { %264 = vperm.xlu1 %440, %v226_v7   ;;  %259 = vperm.xlu0 %439, %v225_v8  }
  0x6b   : > { %v250_v11 = vpop.permute.xlu2 %249 }
  0x6c   : > { %v275_v12 = vmul.f32 %v250_v11, %v211_v9  ;;  %v276_v13 = vmul.f32 %v250_v11, %v212_v10 }
  0x6e   : > { %291 = vst [vmem:[%s513_s23 + $0x40] sm:$0xff] %v275_v12 }
  0x6f   : > { %292 = vst [vmem:[%s513_s23 + $0x48] sm:$0xff] %v276_v13 }
  0x73   : > { %v255_v16 = vpop.permute.xlu2 %254 }
  0x74   : > { %v277_v17 = vmul.f32 %v255_v16, %v213_v14  ;;  %v278_v18 = vmul.f32 %v255_v16, %v214_v15 }
  0x76   : > { %293 = vst [vmem:[%s513_s23 + $0x50] sm:$0xff] %v277_v17 }
  0x77   : > { %294 = vst [vmem:[%s513_s23 + $0x58] sm:$0xff] %v278_v18 }
  0x82   : > { %v240_v23 = vpop.permute.xlu1 %239  ;;  %v230_v24 = vpop.permute.xlu0 %229 }
  0x83   : > { %v271_v25 = vmul.f32 %v240_v23, %v207_v19  ;;  %v272_v26 = vmul.f32 %v240_v23, %v208_v20  ;;  %v267_v27 = vmul.f32 %v230_v24, %v203_v21  ;;  %v268_v28 = vmul.f32 %v230_v24, %v204_v22 }
  0x85   : > { %287 = vst [vmem:[%s513_s23 + $0x20] sm:$0xff] %v271_v25 }
  0x86   : > { %288 = vst [vmem:[%s513_s23 + $0x28] sm:$0xff] %v272_v26 }
  0x87   : > { %283 = vst [vmem:[%s513_s23] sm:$0xff] %v267_v27 }
  0x88   : > { %284 = vst [vmem:[%s513_s23 + $0x8] sm:$0xff] %v268_v28 }
  0x8a   : > { %v245_v33 = vpop.permute.xlu1 %244  ;;  %v235_v34 = vpop.permute.xlu0 %234 }
  0x8b   : > { %v273_v35 = vmul.f32 %v245_v33, %v209_v29  ;;  %v274_v36 = vmul.f32 %v245_v33, %v210_v30  ;;  %v269_v37 = vmul.f32 %v235_v34, %v205_v31  ;;  %v270_v38 = vmul.f32 %v235_v34, %v206_v32 }
  0x8d   : > { %289 = vst [vmem:[%s513_s23 + $0x30] sm:$0xff] %v273_v35 }
  0x8e   : > { %290 = vst [vmem:[%s513_s23 + $0x38] sm:$0xff] %v274_v36 }
  0x8f   : > { %285 = vst [vmem:[%s513_s23 + $0x10] sm:$0xff] %v269_v37 }
  0x90   : > { %286 = vst [vmem:[%s513_s23 + $0x18] sm:$0xff] %v270_v38 }
  0x92   : > { %v265_v43 = vpop.permute.xlu1 %264  ;;  %v260_v44 = vpop.permute.xlu0 %259 }
  0x93   : > { %v281_v45 = vmul.f32 %v265_v43, %v217_v39  ;;  %v282_v46 = vmul.f32 %v265_v43, %v218_v40  ;;  %v279_v47 = vmul.f32 %v260_v44, %v215_v41  ;;  %v280_v48 = vmul.f32 %v260_v44, %v216_v42 }
  0x95   : > { %297 = vst [vmem:[%s513_s23 + $0x70] sm:$0xff] %v281_v45 }
  0x96   : > { %298 = vst [vmem:[%s513_s23 + $0x78] sm:$0xff] %v282_v46 }
  0x97   : > { %295 = vst [vmem:[%s513_s23 + $0x60] sm:$0xff] %v279_v47 }
  0x98   : > { %296 = vst [vmem:[%s513_s23 + $0x68] sm:$0xff] %v280_v48 }
  0x99 PF: > { %s12_s11 = sadd.s32 1, %s464_s11   ;;  %s557_s9 = smov %s460_s10 }
  0x9a   : > { %p9_p5 = scmp.ge.s32.totalorder %s12_s11, 4   ;;  %s558_s10 = smov %s560_s12 }
  0x9c   :  { %11 = sbr.rel (!%p9_p5) target bundleno = 2 (0x2), region = 61 }

// kernel: cca_forward.2
= control target key start
LH: loop header
LB: loop body
LE: loop exit
PB: predicated region body
PF: predicated region fallthrough
CT: control target
= control target key end

     0   :  { %s1171_s18 = smov 0   ;;  %s1173_s19 = smov 0   ;;  %s1490_s0 = inlined_call_operand.vmem [shape: f32[2,64,256], index: 0, kind: input, shape index: {}]   ;;  %s1491_s1 = inlined_call_operand.vmem [shape: f32[4,64], index: 1, kind: input, shape index: {}]   ;;  %s1492_s2 = inlined_call_operand.vmem [shape: f32[4,1], index: 2, kind: input, shape index: {}]   ;;  %s1493_s3 = inlined_call_operand.vmem [shape: f32[64,4], index: 3, kind: input, shape index: {}]   ;;  %s1494_s4 = inlined_call_operand.vmem [shape: f32[64,1], index: 4, kind: input, shape index: {}]   ;;  %s1495_s5 = inlined_call_operand.vmem [shape: f32[2,64,1], index: 5, kind: output, shape index: {}]  }
   0x1   :  { %s1175_s20 = smov 0  }
   0x2 LB: > { %s27_s21 = sadd.s32 1, %s1133_s19  ;;  %p997_p0 = scmp.ge.s32.totalorder %s1137_s20, 1  ;;  %s1137_s20 = sphi %s1175_s20, %s15_s20   ;;  %s1133_s19 = sphi %s1173_s19, %s1499_s19   ;;  %s1129_s18 = sphi %s1171_s18, %s1498_s18  }
   0x3   : > { %p29_p1 = scmp.ge.s32.totalorder %s27_s21, 2  ;;  %p206_p2 = scmp.lt.s32.totalorder %s1137_s20, 3 }
   0x5   : > { %s1501_s21 = smov (%p29_p1, %s27_s21), 0  ;;  %p207_p3 = pnand %p997_p0, %p206_p2 }
   0x6   : > { %p239_p4 = scmp.lt.s32.totalorder (!%p207_p3), %s1129_s18, 1 }
   0x7   : > { %210 = sbr.rel (%p207_p3) target bundleno = 644 (0x284), region = 40 }
   0xc   : > { %s1503_s18 = smov (!%p239_p4, %s1129_s18), 1  ;;  %vm257_vm0 = vcmask 7168   ;;  %v1139_v22 = vmov 0.0  }
   0xd   : > { %s1014_s22 = sshll.u32 %s1503_s18, 7  ;;  %265 = vst.msk [vmem:[#allocation2 + $0x38] sm:$0xff] %vm257_vm0, %v1139_v22  ;;  %s1015_s16 = sshll.u32 %s1503_s18, 6 }
   0xe   : > { %s1195_s25 = scalar_lea.vmem %s1490_s0, %s1014_s22  ;;  %258 = vst.msk [vmem:[#allocation2] sm:$0xff] %vm257_vm0, %v1139_v22  ;;  %s1428_s23 = scalar_lea.vmem %s1495_s5, %s1015_s16 }
   0xf   : > { %v288_v0 = vld [vmem:[%s1195_s25 + $0x70] sm:$0xff]  ;;  %v289_v1 = vld [vmem:[%s1195_s25 + $0x78] sm:$0xff]  ;;  %v282_v5 = vld [vmem:[%s1195_s25 + $0x40] sm:$0xff]  ;;  %259 = vst.msk [vmem:[#allocation2 + $0x8] sm:$0xff] %vm257_vm0, %v1139_v22 }
  0x10   : > { %v284_v2 = vld [vmem:[%s1195_s25 + $0x50] sm:$0xff]  ;;  %v319_v3 = vadd.f32 %v289_v1, %v288_v0  ;;  %v285_v4 = vld [vmem:[%s1195_s25 + $0x58] sm:$0xff]  ;;  %v283_v6 = vld [vmem:[%s1195_s25 + $0x48] sm:$0xff]  ;;  %v361_v11 = vmul.f32 %v288_v0, %v288_v0  ;;  %v362_v12 = vmul.f32 %v289_v1, %v289_v1  ;;  %v355_v20 = vmul.f32 %v282_v5, %v282_v5  ;;  %260 = vst.msk [vmem:[#allocation2 + $0x10] sm:$0xff] %vm257_vm0, %v1139_v22 }
  0x11   : > { %v313_v7 = vadd.f32 %v285_v4, %v284_v2  ;;  %v310_v8 = vadd.f32 %v283_v6, %v282_v5  ;;  %v286_v9 = vld [vmem:[%s1195_s25 + $0x60] sm:$0xff]  ;;  %v287_v10 = vld [vmem:[%s1195_s25 + $0x68] sm:$0xff]  ;;  %v357_v18 = vmul.f32 %v284_v2, %v284_v2  ;;  %v358_v19 = vmul.f32 %v285_v4, %v285_v4  ;;  %v280_v23 = vld [vmem:[%s1195_s25 + $0x30] sm:$0xff]  ;;  %261 = vst.msk [vmem:[#allocation2 + $0x18] sm:$0xff] %vm257_vm0, %v1139_v22 }
  0x12   : > { %320 = vadd.xlane.f32.xlu0 %v319_v3  ;;  %v359_v13 = vmul.f32 %v286_v9, %v286_v9  ;;  %v360_v14 = vmul.f32 %v287_v10, %v287_v10  ;;  %v316_v15 = vadd.f32 %v287_v10, %v286_v9  ;;  %v384_v16 = vadd.f32 %v362_v12, %v361_v11  ;;  %v281_v24 = vld [vmem:[%s1195_s25 + $0x38] sm:$0xff]  ;;  %v278_v30 = vld [vmem:[%s1195_s25 + $0x20] sm:$0xff]  ;;  %v279_v31 = vld [vmem:[%s1195_s25 + $0x28] sm:$0xff] }
  0x13   : > { %314 = vadd.xlane.f32.xlu1 %v313_v7  ;;  %311 = vadd.xlane.f32.xlu2 %v310_v8  ;;  %v356_v21 = vmul.f32 %v283_v6, %v283_v6  ;;  %v378_v25 = vadd.f32 %v358_v19, %v357_v18  ;;  %v307_v27 = vadd.f32 %v281_v24, %v280_v23  ;;  %v276_v32 = vld [vmem:[%s1195_s25 + $0x10] sm:$0xff]  ;;  %v277_v33 = vld [vmem:[%s1195_s25 + $0x18] sm:$0xff]  ;;  %v274_v41 = vld [vmem:[%s1195_s25] sm:$0xff]  ;;  %v1140_v3 = vmov 0  }
  0x14   : > { %v381_v17 = vadd.f32 %v360_v14, %v359_v13  ;;  %262 = vst.msk [vmem:[#allocation2 + $0x20] sm:$0xff] %vm257_vm0, %v1139_v22  ;;  %v353_v28 = vmul.f32 %v280_v23, %v280_v23  ;;  %v354_v29 = vmul.f32 %v281_v24, %v281_v24  ;;  %v304_v34 = vadd.f32 %v279_v31, %v278_v30  ;;  %v275_v42 = vld [vmem:[%s1195_s25 + $0x8] sm:$0xff]  ;;  %v297_v49 = vld [vmem:[#allocation2 + $0x38] sm:$0xff] }
  0x15   : > { %v375_v26 = vadd.f32 %v356_v21, %v355_v20  ;;  %263 = vst.msk [vmem:[#allocation2 + $0x28] sm:$0xff] %vm257_vm0, %v1139_v22  ;;  %v301_v36 = vadd.f32 %v277_v33, %v276_v32  ;;  %v351_v37 = vmul.f32 %v278_v30, %v278_v30  ;;  %v352_v38 = vmul.f32 %v279_v31, %v279_v31 }
  0x16   : > { %264 = vst.msk [vmem:[#allocation2 + $0x30] sm:$0xff] %vm257_vm0, %v1139_v22  ;;  %v372_v35 = vadd.f32 %v354_v29, %v353_v28  ;;  %v349_v39 = vmul.f32 %v276_v32, %v276_v32  ;;  %v350_v40 = vmul.f32 %v277_v33, %v277_v33  ;;  %v298_v45 = vadd.f32 %v275_v42, %v274_v41  ;;  %v291_v29 = vld [vmem:[#allocation2 + $0x8] sm:$0xff] }
  0x17   : > { %266 = vst.msk [vmem:[#allocation3] sm:$0xff] %vm257_vm0, %v1139_v22  ;;  %v369_v43 = vadd.f32 %v352_v38, %v351_v37  ;;  %v347_v46 = vmul.f32 %v274_v41, %v274_v41  ;;  %v348_v47 = vmul.f32 %v275_v42, %v275_v42  ;;  %1044 = vset.pattern.permute.xlu1 %v1140_v3 }
  0x18   : > { %267 = vst.msk [vmem:[#allocation3 + $0x8] sm:$0xff] %vm257_vm0, %v1139_v22  ;;  %v366_v44 = vadd.f32 %v350_v40, %v349_v39  ;;  %1050 = vset.pattern.permute.xlu2 %v1140_v3  ;;  %1056 = vset.pattern.permute.xlu0 %v1140_v3  ;;  %v293_v7 = vld [vmem:[#allocation2 + $0x18] sm:$0xff] }
  0x19   : > { %268 = vst.msk [vmem:[#allocation3 + $0x10] sm:$0xff] %vm257_vm0, %v1139_v22  ;;  %v363_v48 = vadd.f32 %v348_v47, %v347_v46 }
  0x1a   : > { %317 = vadd.xlane.f32.xlu0 %v316_v15  ;;  %269 = vst.msk [vmem:[#allocation3 + $0x18] sm:$0xff] %vm257_vm0, %v1139_v22 }
  0x1b   : > { %385 = vadd.xlane.f32.xlu1 %v384_v16  ;;  %382 = vadd.xlane.f32.xlu2 %v381_v17  ;;  %270 = vst.msk [vmem:[#allocation3 + $0x20] sm:$0xff] %vm257_vm0, %v1139_v22  ;;  %v294_v51 = vld [vmem:[#allocation2 + $0x20] sm:$0xff] }
  0x1c   : > { %271 = vst.msk [vmem:[#allocation3 + $0x28] sm:$0xff] %vm257_vm0, %v1139_v22  ;;  %v295_v50 = vld [vmem:[#allocation2 + $0x28] sm:$0xff] }
  0x1d   : > { %272 = vst.msk [vmem:[#allocation3 + $0x30] sm:$0xff] %vm257_vm0, %v1139_v22  ;;  %v296_v58 = vld [vmem:[#allocation2 + $0x30] sm:$0xff] }
  0x1e   : > { %273 = vst.msk [vmem:[#allocation3 + $0x38] sm:$0xff] %vm257_vm0, %v1139_v22 }
  0x20   : > { %v341_v47 = vld [vmem:[#allocation3 + $0x10] sm:$0xff] }
  0x21   : > { %v342_v28 = vld [vmem:[#allocation3 + $0x18] sm:$0xff] }
  0x22   : > { %379 = vadd.xlane.f32.xlu0 %v378_v25  ;;  %v343_v6 = vld [vmem:[#allocation3 + $0x20] sm:$0xff]  ;;  %v292_v25 = vld [vmem:[#allocation2 + $0x10] sm:$0xff] }
  0x23   : > { %376 = vadd.xlane.f32.xlu2 %v375_v26  ;;  %308 = vadd.xlane.f32.xlu1 %v307_v27  ;;  %v344_v5 = vld [vmem:[#allocation3 + $0x28] sm:$0xff] }
  0x24   : > { %v345_v60 = vld [vmem:[#allocation3 + $0x30] sm:$0xff] }
  0x25   : > { %v346_v59 = vld [vmem:[#allocation3 + $0x38] sm:$0xff] }
  0x2a   : > { %305 = vadd.xlane.f32.xlu0 %v304_v34 }
  0x2b   : > { %373 = vadd.xlane.f32.xlu1 %v372_v35  ;;  %302 = vadd.xlane.f32.xlu2 %v301_v36 }
  0x32   : > { %370 = vadd.xlane.f32.xlu0 %v369_v43 }
  0x33   : > { %367 = vadd.xlane.f32.xlu2 %v366_v44  ;;  %299 = vadd.xlane.f32.xlu1 %v298_v45 }
  0x3a   : > { %364 = vadd.xlane.f32.xlu0 %v363_v48 }
  0x85   : > { %v321_v52 = vpop.xlane.xlu0 %320 }
  0x86   : > { %v329_v53 = vadd.f32 %v321_v52, %v297_v49  ;;  %v315_v54 = vpop.xlane.xlu1 %314  ;;  %v312_v55 = vpop.xlane.xlu2 %311 }
  0x87   : > { %v327_v56 = vadd.f32 %v315_v54, %v295_v50  ;;  %v326_v57 = vadd.f32 %v312_v55, %v294_v51  ;;  %v340_v50 = vld [vmem:[#allocation3 + $0x8] sm:$0xff]  ;;  %v290_v51 = vld [vmem:[#allocation2] sm:$0xff] }
  0x88   : > { %338 = vst.msk [vmem:[#allocation2 + $0x38] sm:$0xff] %vm257_vm0, %v329_v53 }
  0x89   : > { %336 = vst.msk [vmem:[#allocation2 + $0x28] sm:$0xff] %vm257_vm0, %v327_v56 }
  0x8a   : > { %335 = vst.msk [vmem:[#allocation2 + $0x20] sm:$0xff] %vm257_vm0, %v326_v57 }
  0x8d   : > { %v318_v61 = vpop.xlane.xlu0 %317 }
  0x8e   : > { %v328_v62 = vadd.f32 %v318_v61, %v296_v58  ;;  %v386_v63 = vpop.xlane.xlu1 %385  ;;  %v383_v0 = vpop.xlane.xlu2 %382 }
  0x8f   : > { %v394_v1 = vadd.f32 %v386_v63, %v346_v59  ;;  %v393_v2 = vadd.f32 %v383_v0, %v345_v60  ;;  %v413_v4 = vld [vmem:[#allocation2 + $0x38] sm:$0xff] }
  0x90   : > { %337 = vst.msk [vmem:[#allocation2 + $0x30] sm:$0xff] %vm257_vm0, %v328_v62  ;;  %v1235_v9 = vmul.f32 0.00390625, %v413_v4  ;;  %v411_v24 = vld [vmem:[#allocation2 + $0x28] sm:$0xff] }
  0x91   : > { %402 = vst.msk [vmem:[#allocation3 + $0x38] sm:$0xff] %vm257_vm0, %v394_v1  ;;  %v410_v18 = vld [vmem:[#allocation2 + $0x20] sm:$0xff]  ;;  %v1250_v33 = vmul.f32 0.00390625, %v411_v24 }
  0x92   : > { %401 = vst.msk [vmem:[#allocation3 + $0x30] sm:$0xff] %vm257_vm0, %v393_v2  ;;  %v445_v21 = vmul.f32 %v1235_v9, %v1235_v9  ;;  %v1246_v27 = vmul.f32 0.00390625, %v410_v18 }
  0x93   : > { %v443_v45 = vmul.f32 %v1250_v33, %v1250_v33 }
  0x94   : > { %v442_v41 = vmul.f32 %v1246_v27, %v1246_v27 }
  0x95   : > { %v380_v8 = vpop.xlane.xlu0 %379 }
  0x96   : > { %v392_v10 = vadd.f32 %v380_v8, %v344_v5  ;;  %v377_v11 = vpop.xlane.xlu2 %376  ;;  %v309_v12 = vpop.xlane.xlu1 %308  ;;  %v339_v8 = vld [vmem:[#allocation3] sm:$0xff] }
  0x97   : > { %v391_v13 = vadd.f32 %v377_v11, %v343_v6  ;;  %v325_v14 = vadd.f32 %v309_v12, %v293_v7  ;;  %v412_v15 = vld [vmem:[#allocation2 + $0x30] sm:$0xff] }
  0x98   : > { %400 = vst.msk [vmem:[#allocation3 + $0x28] sm:$0xff] %vm257_vm0, %v392_v10  ;;  %v1238_v16 = vmul.f32 0.00390625, %v412_v15  ;;  %v429_v17 = vld [vmem:[#allocation3 + $0x38] sm:$0xff] }
  0x99   : > { %399 = vst.msk [vmem:[#allocation3 + $0x20] sm:$0xff] %vm257_vm0, %v391_v13  ;;  %v428_v19 = vld [vmem:[#allocation3 + $0x30] sm:$0xff]  ;;  %v437_v20 = vmul.f32 0.00390625, %v429_v17 }
  0x9a   : > { %334 = vst.msk [vmem:[#allocation2 + $0x18] sm:$0xff] %vm257_vm0, %v325_v14  ;;  %v436_v22 = vmul.f32 0.00390625, %v428_v19  ;;  %v444_v23 = vmul.f32 %v1238_v16, %v1238_v16 }
  0x9b   : > { %v453_v26 = vsub.f32 %v437_v20, %v445_v21 }
  0x9c   : > { %v452_v30 = vsub.f32 %v436_v22, %v444_v23 }
  0x9d   : > { %v306_v31 = vpop.xlane.xlu0 %305  ;;  %v1248_v32 = vmax.f32 %v453_v26, 0.0 }
  0x9e   : > { %v374_v34 = vpop.xlane.xlu1 %373  ;;  %v324_v35 = vadd.f32 %v306_v31, %v292_v25  ;;  %v303_v36 = vpop.xlane.xlu2 %302  ;;  %v1252_v37 = vmax.f32 %v452_v30, 0.0 }
  0x9f   : > { %v390_v38 = vadd.f32 %v374_v34, %v342_v28  ;;  %v323_v39 = vadd.f32 %v303_v36, %v291_v29  ;;  %1067 = vrsqrt.f32 %v1248_v32  ;;  %v427_v40 = vld [vmem:[#allocation3 + $0x28] sm:$0xff]  ;;  %vm553_vm2 = vcmp.eq.f32.partialorder %v1248_v32, inf }
  0xa0   : > { %333 = vst.msk [vmem:[#allocation2 + $0x10] sm:$0xff] %vm257_vm0, %v324_v35  ;;  %1069 = vrsqrt.f32 %v1252_v37  ;;  %v426_v42 = vld [vmem:[#allocation3 + $0x20] sm:$0xff]  ;;  %v435_v44 = vmul.f32 0.00390625, %v427_v40  ;;  %vm541_vm1 = vcmp.eq.f32.partialorder %v1252_v37, inf  ;;  %v544_v25 = vand.u32 2147483648, %v1252_v37 }
  0xa1   : > { %398 = vst.msk [vmem:[#allocation3 + $0x18] sm:$0xff] %vm257_vm0, %v390_v38  ;;  %v434_v43 = vmul.f32 0.00390625, %v426_v42  ;;  %v409_v46 = vld [vmem:[#allocation2 + $0x18] sm:$0xff]  ;;  %vm555_vm3 = vcmp.eq.f32.partialorder %v1248_v32, 0.0  ;;  %v556_v38 = vand.u32 2147483648, %v1248_v32  ;;  %vm543_vm4 = vcmp.eq.f32.partialorder %v1252_v37, 0.0 }
  0xa2   : > { %332 = vst.msk [vmem:[#allocation2 + $0x8] sm:$0xff] %vm257_vm0, %v323_v39  ;;  %v451_v49 = vsub.f32 %v435_v44, %v443_v45  ;;  %v1263_v52 = vmul.f32 0.00390625, %v409_v46 }
  0xa3   : > { %v450_v48 = vsub.f32 %v434_v43, %v442_v41 }
  0xa4   : > { %v1267_v56 = vmax.f32 %v451_v49, 0.0  ;;  %v441_v4 = vmul.f32 %v1263_v52, %v1263_v52 }
  0xa5   : > { %v1068_v53 = vpop.eup %1067  ;;  %v371_v54 = vpop.xlane.xlu0 %370  ;;  %v1265_v55 = vmax.f32 %v450_v48, 0.0 }
  0xa6   : > { %v1070_v57 = vpop.eup %1069  ;;  %v389_v58 = vadd.f32 %v371_v54, %v341_v47  ;;  %v368_v59 = vpop.xlane.xlu2 %367  ;;  %v547_v61 = vmul.f32 %v1068_v53, %v1248_v32  ;;  %vm529_vm7 = vcmp.eq.f32.partialorder %v1267_v56, inf  ;;  %vm531_vm8 = vcmp.eq.f32.partialorder %v1267_v56, 0.0 }
  0xa7   : > { %v300_v60 = vpop.xlane.xlu1 %299  ;;  %v388_v62 = vadd.f32 %v368_v59, %v340_v50  ;;  %v535_v0 = vmul.f32 %v1070_v57, %v1252_v37  ;;  %1071 = vrsqrt.f32 %v1265_v55  ;;  %v408_v2 = vld [vmem:[#allocation2 + $0x10] sm:$0xff]  ;;  %vm517_vm5 = vcmp.eq.f32.partialorder %v1265_v55, inf }
  0xa8   : > { %v322_v63 = vadd.f32 %v300_v60, %v290_v51  ;;  %397 = vst.msk [vmem:[#allocation3 + $0x10] sm:$0xff] %vm257_vm0, %v389_v58  ;;  %v548_v1 = vmul.f32 %v1068_v53, %v547_v61  ;;  %v425_v3 = vld [vmem:[#allocation3 + $0x18] sm:$0xff]  ;;  %1073 = vrsqrt.f32 %v1267_v56  ;;  %v1278_v11 = vmul.f32 0.00390625, %v408_v2 }
  0xa9   : > { %396 = vst.msk [vmem:[#allocation3 + $0x8] sm:$0xff] %vm257_vm0, %v388_v62  ;;  %v536_v5 = vmul.f32 %v1070_v57, %v535_v0  ;;  %v433_v7 = vmul.f32 0.00390625, %v425_v3  ;;  %v407_v14 = vld [vmem:[#allocation2 + $0x8] sm:$0xff]  ;;  %vm519_vm6 = vcmp.eq.f32.partialorder %v1265_v55, 0.0  ;;  %v520_v0 = vand.u32 2147483648, %v1265_v55 }
  0xaa   : > { %331 = vst.msk [vmem:[#allocation2] sm:$0xff] %vm257_vm0, %v322_v63  ;;  %v549_v6 = vmul.f32 0.5, %v548_v1  ;;  %v440_v28 = vmul.f32 %v1278_v11, %v1278_v11  ;;  %v1288_v29 = vmul.f32 0.00390625, %v407_v14 }
  0xab   : > { %v537_v10 = vmul.f32 0.5, %v536_v5  ;;  %v449_v13 = vsub.f32 %v433_v7, %v441_v4  ;;  %v532_v7 = vand.u32 2147483648, %v1267_v56 }
  0xac   : > { %v550_v12 = vsub.f32 1.5, %v549_v6  ;;  %v439_v51 = vmul.f32 %v1288_v29, %v1288_v29 }
  0xad   : > { %v1072_v15 = vpop.eup %1071  ;;  %v365_v17 = vpop.xlane.xlu0 %364  ;;  %v538_v18 = vsub.f32 1.5, %v537_v10  ;;  %v1283_v22 = vmax.f32 %v449_v13, 0.0 }
  0xae   : > { %v387_v19 = vadd.f32 %v365_v17, %v339_v8  ;;  %v551_v20 = vmul.f32 %v1068_v53, %v550_v12  ;;  %v511_v21 = vmul.f32 %v1072_v15, %v1265_v55  ;;  %v1074_v23 = vpop.eup %1073 }
  0xaf   : > { %v539_v24 = vmul.f32 %v1070_v57, %v538_v18  ;;  %v424_v26 = vld [vmem:[#allocation3 + $0x10] sm:$0xff]  ;;  %v523_v34 = vmul.f32 %v1074_v23, %v1267_v56  ;;  %1075 = vrsqrt.f32 %v1283_v22  ;;  %vm505_vm9 = vcmp.eq.f32.partialorder %v1283_v22, inf }
  0xb0   : > { %395 = vst.msk [vmem:[#allocation3] sm:$0xff] %vm257_vm0, %v387_v19  ;;  %v552_v30 = vmul.f32 %v551_v20, %v1248_v32  ;;  %v512_v31 = vmul.f32 %v1072_v15, %v511_v21  ;;  %v432_v35 = vmul.f32 0.00390625, %v424_v26  ;;  %v423_v44 = vld [vmem:[#allocation3 + $0x8] sm:$0xff]  ;;  %v607_v19 = vld [vmem:[%s1492_s2] sm:$0xf]  ;;  %vm507_vm10 = vcmp.eq.f32.partialorder %v1283_v22, 0.0 }
  0xb1   : > { %v540_v36 = vmul.f32 %v539_v24, %v1252_v37  ;;  %v406_v39 = vld [vmem:[#allocation2] sm:$0xff]  ;;  %v524_v42 = vmul.f32 %v1074_v23, %v523_v34  ;;  %v431_v57 = vmul.f32 0.00390625, %v423_v44 }
  0xb2   : > { %v554_v40 = vsel %vm553_vm2, %v1248_v32, %v552_v30  ;;  %v513_v41 = vmul.f32 0.5, %v512_v31  ;;  %v448_v43 = vsub.f32 %v432_v35, %v440_v28  ;;  %v1304_v47 = vmul.f32 0.00390625, %v406_v39  ;;  %v647_v31 = vld [vmem:[%s1494_s4 + $0x8] sm:$0xff] }
  0xb3   : > { %v542_v45 = vsel %vm541_vm1, %v1252_v37, %v540_v36  ;;  %v557_v46 = vsel %vm555_vm3, %v556_v38, %v554_v40  ;;  %v525_v50 = vmul.f32 0.5, %v524_v42  ;;  %v447_v2 = vsub.f32 %v431_v57, %v439_v51 }
  0xb4   : > { %v545_v48 = vsel %vm543_vm4, %v544_v25, %v542_v45  ;;  %v514_v49 = vsub.f32 1.5, %v513_v41  ;;  %v565_v53 = vadd.f32 %v557_v46, %v1235_v9  ;;  %v1310_v54 = vmax.f32 %v448_v43, 0.0 }
  0xb5   : > { %v564_v32 = vadd.f32 %v545_v48, %v1238_v16  ;;  %v526_v59 = vsub.f32 1.5, %v525_v50  ;;  %v1076_v60 = vpop.eup %1075  ;;  %v438_v62 = vmul.f32 %v1304_v47, %v1304_v47  ;;  %v1324_v10 = vmax.f32 %v447_v2, 0.0  ;;  %v653_v2 = vld [vmem:[%s1494_s4 + $0x38] sm:$0xff] }
  0xb6   : > { %v515_v58 = vmul.f32 %v1072_v15, %v514_v49  ;;  %1077 = vrsqrt.f32 %v1310_v54  ;;  %v499_v9 = vmul.f32 %v1076_v60, %v1283_v22  ;;  %v508_v39 = vand.u32 2147483648, %v1283_v22 }
  0xb7   : > { %v1045_v37 = vpack.i.bf16 %v564_v32, %v565_v53  ;;  %v422_v61 = vld [vmem:[#allocation3] sm:$0xff]  ;;  %v527_v16 = vmul.f32 %v1074_v23, %v526_v59  ;;  %1079 = vrsqrt.f32 %v1324_v10  ;;  %vm493_vm11 = vcmp.eq.f32.partialorder %v1310_v54, inf }
  0xb8   : > { %v516_v63 = vmul.f32 %v515_v58, %v1265_v55  ;;  %v430_v1 = vmul.f32 0.00390625, %v422_v61  ;;  %v500_v5 = vmul.f32 %v1076_v60, %v499_v9  ;;  %v496_v43 = vand.u32 2147483648, %v1310_v54  ;;  %v649_v58 = vld [vmem:[%s1494_s4 + $0x18] sm:$0xff]  ;;  %v650_v9 = vld [vmem:[%s1494_s4 + $0x20] sm:$0xff] }
  0xb9   : > { %1046 = vperm.xlu1 %1044, %v1045_v37   ;;  %v528_v4 = vmul.f32 %v527_v16, %v1267_v56  ;;  %vm495_vm12 = vcmp.eq.f32.partialorder %v1310_v54, 0.0  ;;  %vm481_vm13 = vcmp.eq.f32.partialorder %v1324_v10, inf  ;;  %v484_v53 = vand.u32 2147483648, %v1324_v10 }
  0xba   : > { %v518_v3 = vsel %vm517_vm5, %v1265_v55, %v516_v63  ;;  %v446_v8 = vsub.f32 %v430_v1, %v438_v62  ;;  %v501_v14 = vmul.f32 0.5, %v500_v5  ;;  %vm483_vm14 = vcmp.eq.f32.partialorder %v1324_v10, 0.0  ;;  %v652_v1 = vld [vmem:[%s1494_s4 + $0x30] sm:$0xff] }
  0xbb   : > { %v521_v6 = vsel %vm519_vm6, %v520_v0, %v518_v3  ;;  %v530_v12 = vsel %vm529_vm7, %v1267_v56, %v528_v4  ;;  %v651_v3 = vld [vmem:[%s1494_s4 + $0x28] sm:$0xff]  ;;  %vm613_vm2 = vcmask 523264   ;;  %vm719_vm3 = vcmask 1043456  }
  0xbc   : > { %v562_v13 = vadd.f32 %v521_v6, %v1246_v27  ;;  %v1078_v15 = vpop.eup %1077  ;;  %v533_v55 = vsel %vm531_vm8, %v532_v7, %v530_v12  ;;  %v454_v17 = vmax.f32 %v446_v8, 0.0  ;;  %v502_v21 = vsub.f32 1.5, %v501_v14 }
  0xbd   : > { %v563_v18 = vadd.f32 %v533_v55, %v1250_v33  ;;  %v487_v20 = vmul.f32 %v1078_v15, %v1310_v54  ;;  %v1080_v26 = vpop.eup %1079  ;;  %vm694_vm4 = vcmask 31744  }
  0xbe   : > { %1081 = vrsqrt.f32 %v454_v17  ;;  %v503_v24 = vmul.f32 %v1076_v60, %v502_v21  ;;  %v475_v33 = vmul.f32 %v1080_v26, %v1324_v10  ;;  %vm469_vm15 = vcmp.eq.f32.partialorder %v454_v17, inf }
  0xbf   : > { %v1051_v23 = vpack.i.bf16 %v562_v13, %v563_v18  ;;  %v488_v56 = vmul.f32 %v1078_v15, %v487_v20  ;;  %vm471_vm1 = vcmp.eq.f32.partialorder %v454_v17, 0.0  ;;  %v606_v18 = vld [vmem:[%s1491_s1] sm:$0xf] }
  0xc0   : > { %v504_v25 = vmul.f32 %v503_v24, %v1283_v22  ;;  %v476_v38 = vmul.f32 %v1080_v26, %v475_v33  ;;  %v641_v24 = vld [vmem:[%s1493_s3 + $0x18] sm:$0xff]  ;;  %v640_v33 = vld [vmem:[%s1493_s3 + $0x10] sm:$0xff] }
  0xc1   : > { %610 = vperm.xlu1 %1044, %v607_v19   ;;  %1052 = vperm.xlu2 %1050, %v1051_v23   ;;  %v489_v27 = vmul.f32 0.5, %v488_v56  ;;  %v638_v56 = vld [vmem:[%s1493_s3] sm:$0xff] }
  0xc2   : > { %v506_v35 = vsel %vm505_vm9, %v1283_v22, %v504_v25  ;;  %v477_v42 = vmul.f32 0.5, %v476_v38  ;;  %v639_v25 = vld [vmem:[%s1493_s3 + $0x8] sm:$0xff] }
  0xc3   : > { %v490_v28 = vsub.f32 1.5, %v489_v27  ;;  %v509_v44 = vsel %vm507_vm10, %v508_v39, %v506_v35  ;;  %v644_v27 = vld [vmem:[%s1493_s3 + $0x30] sm:$0xff] }
  0xc4   : > { %v1082_v30 = vpop.eup %1081  ;;  %v478_v48 = vsub.f32 1.5, %v477_v42  ;;  %v561_v51 = vadd.f32 %v509_v44, %v1263_v52 }
  0xc5   : > { %v491_v34 = vmul.f32 %v1078_v15, %v490_v28  ;;  %v463_v36 = vmul.f32 %v1082_v30, %v454_v17  ;;  %v645_v28 = vld [vmem:[%s1493_s3 + $0x38] sm:$0xff] }
  0xc6   : > { %v479_v32 = vmul.f32 %v1080_v26, %v478_v48  ;;  %v642_v26 = vld [vmem:[%s1493_s3 + $0x20] sm:$0xff] }
  0xc7   : > { %v492_v40 = vmul.f32 %v491_v34, %v1310_v54  ;;  %v464_v41 = vmul.f32 %v1082_v30, %v463_v36 }
  0xc9   : > { %661 = vperm.xlu1 %1044, %v647_v31   ;;  %v494_v45 = vsel %vm493_vm11, %v1310_v54, %v492_v40  ;;  %v465_v46 = vmul.f32 0.5, %v464_v41  ;;  %v480_v54 = vmul.f32 %v479_v32, %v1324_v10 }
  0xca   : > { %v497_v49 = vsel %vm495_vm12, %v496_v43, %v494_v45 }
  0xcb   : > { %v560_v50 = vadd.f32 %v497_v49, %v1278_v11  ;;  %v466_v22 = vsub.f32 1.5, %v465_v46  ;;  %v472_v11 = vand.u32 2147483648, %v454_v17  ;;  %v482_v60 = vsel %vm481_vm13, %v1324_v10, %v480_v54 }
  0xcc   : > { %v485_v37 = vsel %vm483_vm14, %v484_v53, %v482_v60 }
  0xcd   : > { %v1057_v57 = vpack.i.bf16 %v560_v50, %v561_v51  ;;  %v467_v59 = vmul.f32 %v1082_v30, %v466_v22  ;;  %v559_v16 = vadd.f32 %v485_v37, %v1288_v29  ;;  %v646_v29 = vld [vmem:[%s1494_s4] sm:$0xff]  ;;  %v643_v30 = vld [vmem:[%s1493_s3 + $0x28] sm:$0xff] }
  0xcf   : > { %1058 = vperm.xlu0 %1056, %v1057_v57   ;;  %v468_v52 = vmul.f32 %v467_v59, %v454_v17 }
  0xd1   : > { %671 = vperm.xlu1 %1044, %v649_v58   ;;  %v470_v61 = vsel %vm469_vm15, %v454_v17, %v468_v52 }
  0xd2   : > { %v473_v62 = vsel %vm471_vm1, %v472_v11, %v470_v61 }
  0xd3   : > { %v558_v63 = vadd.f32 %v473_v62, %v1304_v47  ;;  %v648_v47 = vld [vmem:[%s1494_s4 + $0x10] sm:$0xff] }
  0xd5   : > { %v1062_v0 = vpack.i.bf16 %v558_v63, %v559_v16 }
  0xd7   : > { %676 = vperm.xlu0 %1056, %v650_v9   ;;  %1063 = vperm.xlu2 %1050, %v1062_v0  }
  0xd9   : > { %686 = vperm.xlu1 %1044, %v652_v1  }
  0xdf   : > { %691 = vperm.xlu0 %1056, %v653_v2   ;;  %656 = vperm.xlu2 %1050, %v646_v29  }
  0xe7   : > { %666 = vperm.xlu2 %1050, %v648_v47  }
  0xef   : > { %681 = vperm.xlu2 %1050, %v651_v3  }
 0x11b   : > { %v1053_v6 = vpop.permute.xlu2 %1052 }
 0x11c   : > { %v1054_v8 = vunpack.i.l.bf16 %v1053_v6  ;;  %v1055_v10 = vunpack.i.h.bf16 %v1053_v6 }
 0x12b   : > { %v1047_v4 = vpop.permute.xlu1 %1046 }
 0x12c   : > { %v1048_v5 = vunpack.i.l.bf16 %v1047_v4  ;;  %v1049_v7 = vunpack.i.h.bf16 %v1047_v4 }
 0x12e   : > { %625 = vmatpush.msra.mxu0 %v1048_v5 }
 0x130   : > { %626 = vmatpush.msra.mxu0 %v1049_v7 }
 0x131   : > { %v1064_v14 = vpop.permute.xlu2 %1063 }
 0x132   : > { %627 = vmatpush.msra.mxu0 %v1054_v8  ;;  %v1065_v55 = vunpack.i.l.bf16 %v1064_v14  ;;  %v1066_v17 = vunpack.i.h.bf16 %v1064_v14 }
 0x133   : > { %v611_v19 = vpop.permute.xlu1 %610 }
 0x134   : > { %628 = vmatpush.msra.mxu0 %v1055_v10 }
 0x139   : > { %v657_v35 = vpop.permute.xlu2 %656 }
 0x13b   : > { %v662_v31 = vpop.permute.xlu1 %661 }
 0x141   : > { %v1059_v12 = vpop.permute.xlu0 %1058  ;;  %v667_v59 = vpop.permute.xlu2 %666 }
 0x142   : > { %v1060_v13 = vunpack.i.l.bf16 %v1059_v12  ;;  %v1061_v15 = vunpack.i.h.bf16 %v1059_v12 }
 0x143   : > { %v672_v34 = vpop.permute.xlu1 %671 }
 0x144   : > { %629 = vmatpush.msra.mxu0 %v1060_v13 }
 0x146   : > { %630 = vmatpush.msra.mxu0 %v1061_v15 }
 0x148   : > { %631 = vmatpush.msra.mxu0 %v1065_v55 }
 0x149   : > { %v677_v41 = vpop.permute.xlu0 %676  ;;  %v682_v10 = vpop.permute.xlu2 %681 }
 0x14a   : > { %632 = vmatpush.msra.mxu0 %v1066_v17 }
 0x14b   : > { %1002 = vmatmul.msk.f32.vlgmr.msra.gmra.mxu0 %vm613_vm2, %v606_v18  ;;  %v687_v42 = vpop.permute.xlu1 %686 }
 0x151   : > { %v692_v60 = vpop.permute.xlu0 %691 }
 0x1c8   : > { %v634_v20 = vpop.f32.mrf.mxu0 }
 0x1c9   : > { %v635_v21 = vadd.f32 %v634_v20, %v611_v19 }
 0x1cb   : > { %v637_v23 = vmax.f32 %v635_v21, 0.0 }
 0x1cd   : > { %1003 = vmatpush.msk.msra.mxu1 %vm719_vm3, %v637_v23  ;;  %1016 = vmatpush.msk.msra.mxu2 %vm719_vm3, %v637_v23 }
 0x1ce   : > { %1017 = vmatpush.msk.msra.mxu3 %vm719_vm3, %v637_v23  ;;  %1004 = vmatmul.msk.f32.vlgmr.msra.gmra.mxu1 %vm694_vm4, %v638_v56 }
 0x1cf   : > { %1007 = vmatmul.msk.f32.vlgmr.msra.gmra.mxu2 %vm694_vm4, %v641_v24  ;;  %1010 = vmatmul.msk.f32.vlgmr.msra.gmra.mxu3 %vm694_vm4, %v644_v27 }
 0x1d6   : > { %1005 = vmatmul.msk.f32.gmra.mxu1 %vm694_vm4, %v639_v25 }
 0x1d7   : > { %1008 = vmatmul.msk.f32.gmra.mxu2 %vm694_vm4, %v642_v26  ;;  %1011 = vmatmul.msk.f32.gmra.mxu3 %vm694_vm4, %v645_v28 }
 0x1de   : > { %1006 = vmatmul.msk.f32.gmra.mxu1 %vm694_vm4, %v640_v33 }
 0x1df   : > { %1009 = vmatmul.msk.f32.gmra.mxu2 %vm694_vm4, %v643_v30 }
 0x24b   : > { %v740_v36 = vpop.f32.mrf.mxu1 }
 0x24c   : > { %v741_v38 = vadd.f32 %v740_v36, %v657_v35 }
 0x24e   : > { %v764_v39 = vsub.f32 0.0, %v741_v38 }
 0x250   : > { %v772_v40 = vmul.f32 1.442695, %v764_v39 }
 0x252   : > { %1083 = vpow2.f32 %v772_v40  ;;  %v749_v43 = vpop.f32.mrf.mxu2  ;;  %v758_v44 = vpop.f32.mrf.mxu3 }
 0x253   : > { %v750_v45 = vadd.f32 %v749_v43, %v672_v34  ;;  %v759_v46 = vadd.f32 %v758_v44, %v687_v42  ;;  %v743_v48 = vpop.f32.mrf.mxu1 }
 0x254   : > { %v744_v49 = vadd.f32 %v743_v48, %v662_v31 }
 0x255   : > { %v767_v50 = vsub.f32 0.0, %v750_v45  ;;  %v770_v51 = vsub.f32 0.0, %v759_v46 }
 0x256   : > { %v765_v22 = vsub.f32 0.0, %v744_v49 }
 0x257   : > { %v778_v32 = vmul.f32 1.442695, %v767_v50  ;;  %v784_v53 = vmul.f32 1.442695, %v770_v51 }
 0x258   : > { %v1084_v57 = vpop.eup %1083  ;;  %v774_v58 = vmul.f32 1.442695, %v765_v22 }
 0x259   : > { %v788_v54 = vadd.f32 1.0, %v1084_v57  ;;  %1085 = vpow2.f32 %v778_v32 }
 0x25a   : > { %1087 = vpow2.f32 %v784_v53  ;;  %v752_v11 = vpop.f32.mrf.mxu2  ;;  %v761_v52 = vpop.f32.mrf.mxu3 }
 0x25b   : > { %1089 = vrcp.f32 %v788_v54  ;;  %v746_v37 = vpop.f32.mrf.mxu1  ;;  %v753_v61 = vadd.f32 %v752_v11, %v677_v41  ;;  %v762_v62 = vadd.f32 %v761_v52, %v692_v60  ;;  %v805_v15 = vand.u32 2147483647, %v788_v54 }
 0x25c   : > { %1091 = vpow2.f32 %v774_v58  ;;  %v747_v63 = vadd.f32 %v746_v37, %v667_v59  ;;  %v807_v55 = vand.u32 2147483648, %v788_v54  ;;  %vm801_vm6 = vweird.f32 %v788_v54 }
 0x25d   : > { %v768_v16 = vsub.f32 0.0, %v753_v61  ;;  %v771_v0 = vsub.f32 0.0, %v762_v62  ;;  %vm806_vm8 = vcmp.eq.f32.partialorder %v805_v15, 8.507059e+37 }
 0x25e   : > { %v766_v29 = vsub.f32 0.0, %v747_v63  ;;  %v808_v24 = vor.u32 1.1754944e-38, %v807_v55 }
 0x25f   : > { %v1086_v9 = vpop.eup %1085  ;;  %v780_v4 = vmul.f32 1.442695, %v768_v16  ;;  %v786_v8 = vmul.f32 1.442695, %v771_v0 }
 0x260   : > { %v1088_v1 = vpop.eup %1087  ;;  %v1414_v2 = vadd.f32 1.0, %v1086_v9  ;;  %v776_v14 = vmul.f32 1.442695, %v766_v29 }
 0x261   : > { %v1090_v47 = vpop.eup %1089  ;;  %v1416_v3 = vadd.f32 1.0, %v1088_v1 }
 0x262   : > { %v1092_v5 = vpop.eup %1091  ;;  %v797_v6 = vmul.f32 %v1090_v47, %v788_v54  ;;  %1093 = vrcp.f32 %v1414_v2  ;;  %v755_v7 = vpop.f32.mrf.mxu2  ;;  %vm802_vm5 = vweird.f32 %v1090_v47  ;;  %v850_v21 = vand.u32 2147483647, %v1414_v2 }
 0x263   : > { %1095 = vrcp.f32 %v1416_v3  ;;  %v1420_v13 = vadd.f32 1.0, %v1092_v5  ;;  %v756_v17 = vadd.f32 %v755_v7, %v682_v10  ;;  %vm803_vm7 = vmor %vm801_vm6, %vm802_vm5  ;;  %vm846_vm9 = vweird.f32 %v1414_v2 }
 0x264   : > { %v798_v12 = vsub.f32 1.0, %v797_v6  ;;  %1097 = vpow2.f32 %v780_v4  ;;  %v852_v26 = vand.u32 2147483648, %v1414_v2  ;;  %vm891_vm10 = vweird.f32 %v1416_v3 }
 0x265   : > { %1099 = vrcp.f32 %v1420_v13  ;;  %v769_v23 = vsub.f32 0.0, %v756_v17  ;;  %v897_v35 = vand.u32 2147483648, %v1416_v3  ;;  %vm1438_vm11 = vcmp.eq.f32.partialorder %v850_v21, 8.507059e+37 }
 0x266   : > { %v799_v18 = vmul.f32 %v1090_v47, %v798_v12  ;;  %1101 = vpow2.f32 %v786_v8  ;;  %v895_v40 = vand.u32 2147483647, %v1416_v3  ;;  %v853_v46 = vor.u32 1.1754944e-38, %v852_v26 }
 0x267   : > { %1103 = vpow2.f32 %v776_v14  ;;  %v782_v33 = vmul.f32 1.442695, %v769_v23  ;;  %v898_v50 = vor.u32 1.1754944e-38, %v897_v35  ;;  %v820_v53 = vand.u32 2147483647, %v1420_v13 }
 0x268   : > { %v1094_v19 = vpop.eup %1093  ;;  %v800_v20 = vadd.f32 %v1090_v47, %v799_v18  ;;  %v822_v57 = vand.u32 2147483648, %v1420_v13  ;;  %vm896_vm2 = vcmp.eq.f32.partialorder %v895_v40, 8.507059e+37  ;;  %vm816_vm3 = vweird.f32 %v1420_v13 }
 0x269   : > { %v1096_v56 = vpop.eup %1095  ;;  %v842_v27 = vmul.f32 %v1094_v19, %v1414_v2  ;;  %vm847_vm12 = vweird.f32 %v1094_v19  ;;  %1105 = vpow2.f32 %v782_v33  ;;  %vm821_vm5 = vcmp.eq.f32.partialorder %v820_v53, 8.507059e+37 }
 0x26a   : > { %v804_v25 = vsel %vm803_vm7, %v1090_v47, %v800_v20  ;;  %v887_v28 = vmul.f32 %v1096_v56, %v1416_v3  ;;  %v1098_v30 = vpop.eup %1097  ;;  %vm892_vm13 = vweird.f32 %v1096_v56  ;;  %vm848_vm14 = vmor %vm846_vm9, %vm847_vm12  ;;  %v823_v63 = vor.u32 1.1754944e-38, %v822_v57 }
 0x26b   : > { %v809_v31 = vsel %vm806_vm8, %v808_v24, %v804_v25  ;;  %v843_v34 = vsub.f32 1.0, %v842_v27  ;;  %v1100_v36 = vpop.eup %1099  ;;  %v792_v41 = vadd.f32 1.0, %v1098_v30  ;;  %vm893_vm15 = vmor %vm891_vm10, %vm892_vm13 }
 0x26c   : > { %916 = vst.msk [vmem:[%s1428_s23] sm:$0xff] %vm257_vm0, %v809_v31  ;;  %v888_v39 = vsub.f32 1.0, %v887_v28  ;;  %v1102_v42 = vpop.eup %1101  ;;  %v812_v44 = vmul.f32 %v1100_v36, %v1420_v13  ;;  %vm817_vm1 = vweird.f32 %v1100_v36 }
 0x26d   : > { %v844_v43 = vmul.f32 %v1094_v19, %v843_v34  ;;  %v1104_v45 = vpop.eup %1103  ;;  %1107 = vrcp.f32 %v792_v41  ;;  %v1444_v22 = vadd.f32 1.0, %v1102_v42  ;;  %vm818_vm4 = vmor %vm816_vm3, %vm817_vm1  ;;  %v865_v47 = vand.u32 2147483647, %v792_v41 }
 0x26e   : > { %v889_v48 = vmul.f32 %v1096_v56, %v888_v39  ;;  %v813_v51 = vsub.f32 1.0, %v812_v44  ;;  %v1450_v58 = vadd.f32 1.0, %v1104_v45  ;;  %v867_v3 = vand.u32 2147483648, %v792_v41 }
 0x26f   : > { %v845_v49 = vadd.f32 %v1094_v19, %v844_v43  ;;  %1109 = vrcp.f32 %v1444_v22  ;;  %v1106_v60 = vpop.eup %1105  ;;  %vm861_vm7 = vweird.f32 %v792_v41  ;;  %vm866_vm8 = vcmp.eq.f32.partialorder %v865_v47, 8.507059e+37 }
 0x270   : > { %v890_v32 = vadd.f32 %v1096_v56, %v889_v48  ;;  %v814_v54 = vmul.f32 %v1100_v36, %v813_v51  ;;  %1111 = vrcp.f32 %v1450_v58  ;;  %v793_v1 = vadd.f32 1.0, %v1106_v60 }
 0x271   : > { %v849_v59 = vsel %vm848_vm14, %v1094_v19, %v845_v49  ;;  %v868_v12 = vor.u32 1.1754944e-38, %v867_v3  ;;  %v912_v13 = vand.u32 2147483648, %v1444_v22  ;;  %v910_v15 = vand.u32 2147483647, %v1444_v22 }
 0x272   : > { %v854_v11 = vsel %vm1438_vm11, %v853_v46, %v849_v59  ;;  %v894_v52 = vsel %vm893_vm15, %v1096_v56, %v890_v32  ;;  %v815_v61 = vadd.f32 %v1100_v36, %v814_v54  ;;  %1113 = vrcp.f32 %v793_v1 }
 0x273   : > { %919 = vst.msk [vmem:[%s1428_s23 + $0x18] sm:$0xff] %vm257_vm0, %v854_v11  ;;  %v899_v37 = vsel %vm896_vm2, %v898_v50, %v894_v52  ;;  %v1108_v62 = vpop.eup %1107  ;;  %vm906_vm11 = vweird.f32 %v1444_v22  ;;  %v835_v18 = vand.u32 2147483647, %v1450_v58  ;;  %v837_v19 = vand.u32 2147483648, %v1450_v58 }
 0x274   : > { %922 = vst.msk [vmem:[%s1428_s23 + $0x30] sm:$0xff] %vm257_vm0, %v899_v37  ;;  %v819_v16 = vsel %vm818_vm4, %v1100_v36, %v815_v61  ;;  %v857_v9 = vmul.f32 %v1108_v62, %v792_v41  ;;  %vm862_vm6 = vweird.f32 %v1108_v62  ;;  %v913_v24 = vor.u32 1.1754944e-38, %v912_v13 }
 0x275   : > { %v824_v0 = vsel %vm821_vm5, %v823_v63, %v819_v16  ;;  %v1110_v2 = vpop.eup %1109  ;;  %vm863_vm9 = vmor %vm861_vm7, %vm862_vm6  ;;  %vm911_vm14 = vcmp.eq.f32.partialorder %v910_v15, 8.507059e+37  ;;  %vm831_vm15 = vweird.f32 %v1450_v58  ;;  %v838_v33 = vor.u32 1.1754944e-38, %v837_v19 }
 0x276   : > { %917 = vst.msk [vmem:[%s1428_s23 + $0x8] sm:$0xff] %vm257_vm0, %v824_v0  ;;  %v858_v29 = vsub.f32 1.0, %v857_v9  ;;  %v902_v4 = vmul.f32 %v1110_v2, %v1444_v22  ;;  %v1112_v5 = vpop.eup %1111  ;;  %vm907_vm10 = vweird.f32 %v1110_v2  ;;  %vm836_vm2 = vcmp.eq.f32.partialorder %v835_v18, 8.507059e+37 }
 0x277   : > { %v827_v8 = vmul.f32 %v1112_v5, %v1450_v58  ;;  %vm832_vm12 = vweird.f32 %v1112_v5  ;;  %vm908_vm13 = vmor %vm906_vm11, %vm907_vm10  ;;  %v882_v34 = vand.u32 2147483648, %v793_v1  ;;  %v880_v38 = vand.u32 2147483647, %v793_v1 }
 0x278   : > { %v859_v6 = vmul.f32 %v1108_v62, %v858_v29  ;;  %v903_v7 = vsub.f32 1.0, %v902_v4  ;;  %v1114_v20 = vpop.eup %1113  ;;  %vm833_vm1 = vmor %vm831_vm15, %vm832_vm12  ;;  %vm876_vm4 = vweird.f32 %v793_v1 }
 0x279   : > { %v828_v55 = vsub.f32 1.0, %v827_v8  ;;  %v872_v27 = vmul.f32 %v1114_v20, %v793_v1  ;;  %vm877_vm3 = vweird.f32 %v1114_v20  ;;  %v883_v40 = vor.u32 1.1754944e-38, %v882_v34 }
 0x27a   : > { %v860_v10 = vadd.f32 %v1108_v62, %v859_v6  ;;  %v904_v14 = vmul.f32 %v1110_v2, %v903_v7  ;;  %vm878_vm5 = vmor %vm876_vm4, %vm877_vm3  ;;  %vm881_vm6 = vcmp.eq.f32.partialorder %v880_v38, 8.507059e+37 }
 0x27b   : > { %v829_v56 = vmul.f32 %v1112_v5, %v828_v55  ;;  %v873_v30 = vsub.f32 1.0, %v872_v27 }
 0x27c   : > { %v864_v17 = vsel %vm863_vm9, %v1108_v62, %v860_v10  ;;  %v905_v23 = vadd.f32 %v1110_v2, %v904_v14 }
 0x27d   : > { %v869_v21 = vsel %vm866_vm8, %v868_v12, %v864_v17  ;;  %v830_v26 = vadd.f32 %v1112_v5, %v829_v56  ;;  %v874_v36 = vmul.f32 %v1114_v20, %v873_v30 }
 0x27e   : > { %920 = vst.msk [vmem:[%s1428_s23 + $0x20] sm:$0xff] %vm257_vm0, %v869_v21  ;;  %v909_v25 = vsel %vm908_vm13, %v1110_v2, %v905_v23 }
 0x27f   : > { %v914_v28 = vsel %vm911_vm14, %v913_v24, %v909_v25  ;;  %v834_v31 = vsel %vm833_vm1, %v1112_v5, %v830_v26  ;;  %v875_v39 = vadd.f32 %v1114_v20, %v874_v36 }
 0x280   : > { %923 = vst.msk [vmem:[%s1428_s23 + $0x38] sm:$0xff] %vm257_vm0, %v914_v28  ;;  %v839_v35 = vsel %vm836_vm2, %v838_v33, %v834_v31 }
 0x281   : > { %918 = vst.msk [vmem:[%s1428_s23 + $0x10] sm:$0xff] %vm257_vm0, %v839_v35  ;;  %v879_v41 = vsel %vm878_vm5, %v1114_v20, %v875_v39 }
 0x282   : > { %v884_v42 = vsel %vm881_vm6, %v883_v40, %v879_v41 }
 0x283   : > { %921 = vst.msk [vmem:[%s1428_s23 + $0x28] sm:$0xff] %vm257_vm0, %v884_v42 }
 0x284 PF: > { %s15_s20 = sadd.s32 1, %s1137_s20   ;;  %s1498_s18 = smov %s1133_s19 }
 0x285   : > { %p12_p5 = scmp.ge.s32.totalorder %s15_s20, 4   ;;  %s1499_s19 = smov %s1501_s21 }
 0x287   :  { %14 = sbr.rel (!%p12_p5) target bundleno = 2 (0x2), region = 78 }

</bundles_post_ra>
